<compile_context>
chip_gen: v7x
topology: tpu7x:2x2x1
jax: 0.10.0
libtpu: 0.0.40
codegen_flags: <defaults>
</compile_context>

<pallas_src>
import math
import functools

import jax
import jax.numpy as jnp
from jax.experimental import pallas as pl
from jax.experimental.pallas import tpu as pltpu


def _round_up(v, m):
    return ((v + m - 1) // m) * m


def _cheb_kernel(K, fin_p, tm, l_resident,
                 x_ref, l_ref, w_ref, b_ref, o_ref, feat_ref):
    """One grid step = (Chebyshev order kk+1, row tile i).

    x_ref   : [n_p, fin_p]            resident full block (T_0)
    l_ref   : [n_p, n_p] (resident)   or [tm, n_p] (streamed row tile)
    w_ref   : [K*fin_p, fout_p]       fused 2-D weight, rows ordered W_0..W_{K-1}
    b_ref   : [1, fout_p]
    o_ref   : [n_p, fout_p]           resident output, flushed once at grid end
    feat_ref: [n_p, (K-1)*fin_p]      VMEM scratch holding T_1..T_{K-1}
    """
    kk = pl.program_id(0)                 # Chebyshev order k = kk + 1
    i = pl.program_id(1)                  # row tile index
    row0 = pl.multiple_of(i * tm, tm)     # strong alignment hint (tm | 8)
    rows = pl.ds(row0, tm)

    l_tile = l_ref[rows, :] if l_resident else l_ref[...]     # (tm, n_p)

    # k == 1: T_1 = L @ T_0 for this row tile.
    @pl.when(kk == 0)
    def _():
        feat_ref[rows, 0:fin_p] = jnp.dot(
            l_tile, x_ref[...], preferred_element_type=jnp.float32)

    # k >= 2: T_k = 2 * (L @ T_{k-1}) - T_{k-2}.  K is small & static, so unroll
    # with static (lane-tile-aligned) column offsets, each order gated by
    # pl.when on the sequential order axis.
    for k in range(2, K):
        @pl.when(kk == k - 1)
        def _(k=k):
            t_prev = feat_ref[:, (k - 2) * fin_p:(k - 1) * fin_p]   # T_{k-1}, all rows
            if k == 2:
                t_pm2 = x_ref[rows, :]                              # T_0, this tile
            else:
                t_pm2 = feat_ref[rows, (k - 3) * fin_p:(k - 2) * fin_p]
            t_k = 2.0 * jnp.dot(l_tile, t_prev,
                                preferred_element_type=jnp.float32) - t_pm2
            feat_ref[rows, (k - 1) * fin_p:k * fin_p] = t_k

    # Last order for this row tile: fused weight contraction split into the
    # T_0 (x) part and the T_1..T_{K-1} (scratch) part; lane-dense store into
    # the resident output block (flushed once at grid end).
    @pl.when(kk == K - 2)
    def _():
        acc = jnp.dot(x_ref[rows, :], w_ref[0:fin_p, :],
                      preferred_element_type=jnp.float32)
        acc = acc + jnp.dot(feat_ref[rows, :], w_ref[fin_p:, :],
                            preferred_element_type=jnp.float32)
        o_ref[rows, :] = acc + b_ref[...]


def _plan(N, K, f_in, f_out):
    """Per-generation padding / tiling / VMEM plan."""
    fin_p = _round_up(f_in, 128)
    fout_p = _round_up(f_out, 128)
    n8 = _round_up(N, 8)

    try:
        vmem_cap = int(pltpu.get_tpu_info().vmem_capacity_bytes)
    except Exception:
        vmem_cap = 64 * 1024 * 1024        # conservative (v7x per-TC)
    budget = vmem_cap * 3 // 4             # ~25% headroom for Mosaic scratch

    B = 4  # f32 bytes

    def fixed_bytes(n_p):
        return (n_p * fin_p                # x (resident, single copy)
                + K * fin_p * fout_p       # fused weight (resident)
                + 8 * fout_p               # bias tile
                + 2 * n_p * fout_p         # resident output (+slack)
                + n_p * (K - 1) * fin_p    # persistent T_1..T_{K-1} scratch
                ) * B

    # Start from the MXU-friendly row tile; shrink only if nothing fits.
    tm = min(256, n8)
    while True:
        n_p = _round_up(N, tm)
        res_fits = fixed_bytes(n_p) + n_p * n_p * B <= budget
        stream_fits = fixed_bytes(n_p) + 2 * tm * n_p * B <= budget
        if res_fits or stream_fits or tm <= 8:
            break
        tm = max(8, _round_up(tm // 2, 8))

    n_p = _round_up(N, tm)
    nrt = n_p // tm
    l_resident = fixed_bytes(n_p) + n_p * n_p * B <= budget

    need = fixed_bytes(n_p) + (n_p * n_p * B if l_resident else 3 * tm * n_p * B)
    vmem_limit = int(min(budget, max(need * 5 // 4, 32 * 1024 * 1024)))
    return fin_p, fout_p, tm, n_p, nrt, l_resident, vmem_limit


def chebyshev_conv(x, L, weight, bias=None):
    """Pallas wrapper. x:[N,Fin], L:[N,N], weight:[K,Fin,Fout], bias:[Fout] or None."""
    K, f_in, f_out = weight.shape
    N = x.shape[0]
    assert x.shape == (N, f_in)
    assert L.shape == (N, N)
    assert K >= 2, "Pallas path implements the dense K >= 2 branch of ChebyshevConv"

    f32 = jnp.float32
    x = x.astype(f32)
    L = L.astype(f32)
    weight = weight.astype(f32)

    fin_p, fout_p, tm, n_p, nrt, l_resident, vmem_limit = _plan(N, K, f_in, f_out)

    # Zero padding is mathematically exact (padded rows/cols contribute 0).
    x_p = jnp.zeros((n_p, fin_p), f32).at[:N, :f_in].set(x)
    l_p = jnp.zeros((n_p, n_p), f32).at[:N, :N].set(L)
    w_p = jnp.zeros((K, fin_p, fout_p), f32).at[:, :f_in, :f_out].set(weight)
    w2d = w_p.reshape(K * fin_p, fout_p)        # fused contraction weight
    b_p = jnp.zeros((1, fout_p), f32)
    if bias is not None:
        b_p = b_p.at[0, :f_out].set(bias.astype(f32))

    kernel = functools.partial(_cheb_kernel, K, fin_p, tm, l_resident)

    def call(single_buffer_constants):
        def const_spec(shape):
            # Constant block index -> fetched once; single-buffer it to save VMEM.
            if single_buffer_constants:
                return pl.BlockSpec(shape, lambda kk, i: (0, 0),
                                    pipeline_mode=pl.Buffered(1))
            return pl.BlockSpec(shape, lambda kk, i: (0, 0))

        if l_resident:
            l_spec = const_spec((n_p, n_p))                          # fetched once
        else:
            l_spec = pl.BlockSpec((tm, n_p), lambda kk, i: (i, 0))   # streamed tiles

        return pl.pallas_call(
            kernel,
            out_shape=jax.ShapeDtypeStruct((n_p, fout_p), f32),
            grid_spec=pltpu.PrefetchScalarGridSpec(
                num_scalar_prefetch=0,
                grid=(K - 1, nrt),   # order axis outer (sequential), row tiles inner
                in_specs=[
                    const_spec((n_p, fin_p)),          # x        (resident)
                    l_spec,                            # L        (resident or streamed)
                    const_spec((K * fin_p, fout_p)),   # fused W  (resident)
                    const_spec((1, fout_p)),           # bias     (resident)
                ],
                # Resident output: constant index map -> written in-kernel per
                # row tile, flushed to HBM exactly once at grid end.
                out_specs=pl.BlockSpec((n_p, fout_p), lambda kk, i: (0, 0)),
                scratch_shapes=[pltpu.VMEM((n_p, (K - 1) * fin_p), f32)],
            ),
            compiler_params=pltpu.CompilerParams(
                # Both axes MUST stay sequential: the T-polynomial scratch is
                # shared across row tiles (each order needs all rows of T_{k-1}).
                dimension_semantics=("arbitrary", "arbitrary"),
                vmem_limit_bytes=vmem_limit,
            ),
        )(x_p, l_p, w2d, b_p)

    try:
        out_p = call(single_buffer_constants=True)
    except Exception:
        # Fallback if this JAX build rejects pl.Buffered(1) on resident blocks.
        out_p = call(single_buffer_constants=False)

    return out_p[:N, :f_out]


def reference(x, L, weight, bias):
    """Pure-JAX reference for sanity checking."""
    K = weight.shape[0]
    polys = [x]
    if K >= 2:
        polys.append(L @ x)
        for k in range(2, K):
            polys.append(2.0 * (L @ polys[k - 1]) - polys[k - 2])
    feature = jnp.stack(polys, axis=0)                   # [K, N, Fin]
    out = jnp.einsum('bij,bjk->ik', feature, weight)     # [N, Fout]
    if bias is not None:
        out = out + bias
    return out


if __name__ == "__main__":
    # Small, module-consistent shapes.
    K = 3          # Chebyshev order
    N = 16         # number of graph nodes
    size_in = 16   # input feature dim
    size_out = 32  # output feature dim

    key = jax.random.PRNGKey(0)
    kx, kl, kw, kb = jax.random.split(key, 4)

    x = jax.random.normal(kx, (N, size_in), dtype=jnp.float32)
    # Symmetric (Laplacian-like) operator.
    A = jax.random.normal(kl, (N, N), dtype=jnp.float32)
    L = 0.5 * (A + A.T) / math.sqrt(N)

    # Parameter init mimicking torch kaiming_uniform_(a=sqrt(5)) for [K, Fin, Fout].
    fan_in = size_in * size_out
    gain = math.sqrt(2.0 / (1.0 + 5.0))
    w_bound = gain * math.sqrt(3.0 / fan_in)
    weight = jax.random.uniform(kw, (K, size_in, size_out),
                                minval=-w_bound, maxval=w_bound,
                                dtype=jnp.float32)
    b_bound = 1.0 / math.sqrt(fan_in)
    bias = jax.random.uniform(kb, (size_out,),
                              minval=-b_bound, maxval=b_bound,
                              dtype=jnp.float32)

    out = jax.block_until_ready(chebyshev_conv(x, L, weight, bias))
    ref = jax.block_until_ready(reference(x, L, weight, bias))

    assert out.shape == (N, size_out)
    assert jnp.allclose(out, ref, atol=5e-4, rtol=5e-4), "mismatch vs reference"

    print("KERNEL_OK")
</pallas_src>

<mosaic_0001>
module attributes {stable_mosaic.version = 11 : i64} {
  func.func @_cheb_kernel(%arg0: i32, %arg1: i32, %arg2: memref<16x128xf32, #tpu.memory_space<vmem>>, %arg3: memref<16x16xf32, #tpu.memory_space<vmem>>, %arg4: memref<384x128xf32, #tpu.memory_space<vmem>>, %arg5: memref<1x128xf32, #tpu.memory_space<vmem>>, %arg6: memref<16x128xf32, #tpu.memory_space<vmem>>, %arg7: memref<16x256xf32, #tpu.memory_space<vmem>>) attributes {dimension_semantics = [#tpu.dimension_semantics<arbitrary>, #tpu.dimension_semantics<arbitrary>], iteration_bounds = array<i64: 2, 1>, scalar_prefetch = 0 : i64, scratch_operands = 1 : i64, tpu.core_type = #tpu.core_type<tc>, window_params = [{pipeline_mode = #tpu.pipeline_mode<synchronous>, transform_indices = @transform_0, window_bounds = array<i64: 16, 128>}, {pipeline_mode = #tpu.pipeline_mode<synchronous>, transform_indices = @transform_1, window_bounds = array<i64: 16, 16>}, {pipeline_mode = #tpu.pipeline_mode<synchronous>, transform_indices = @transform_2, window_bounds = array<i64: 384, 128>}, {pipeline_mode = #tpu.pipeline_mode<synchronous>, transform_indices = @transform_3, window_bounds = array<i64: 1, 128>}, {pipeline_mode = #tpu.pipeline_mode<synchronous>, transform_indices = @transform_4, window_bounds = array<i64: 16, 128>}]} {
    %c16_i32 = arith.constant 16 : i32
    %0 = arith.muli %arg1, %c16_i32 : i32
    %1 = tpu.assume_multiple %0, 16 : i32
    %2 = arith.index_cast %1 : i32 to index
    %c0 = arith.constant 0 : index
    %3 = vector.load %arg3[%2, %c0] : memref<16x16xf32, #tpu.memory_space<vmem>>, vector<16x16xf32>
    %c0_i32 = arith.constant 0 : i32
    %4 = arith.cmpi eq, %arg0, %c0_i32 : i32
    %5 = arith.extui %4 : i1 to i32
    %c0_i32_0 = arith.constant 0 : i32
    %6 = arith.cmpi ne, %5, %c0_i32_0 : i32
    scf.if %6 {
      %c0_4 = arith.constant 0 : index
      %c0_5 = arith.constant 0 : index
      %13 = vector.load %arg2[%c0_4, %c0_5] : memref<16x128xf32, #tpu.memory_space<vmem>>, vector<16x128xf32>
      %cst = arith.constant dense<0.000000e+00> : vector<16x128xf32>
      %14 = tpu.matmul %3, %13, %cst {dimension_numbers = #tpu.dot_dimension_numbers<[1], [0], [0], [1], [0, 0, 1, 1], [], []>} : vector<16x16xf32>, vector<16x128xf32>, vector<16x128xf32> -> vector<16x128xf32>
      %15 = arith.index_cast %1 : i32 to index
      %c0_6 = arith.constant 0 : index
      %16 = vector.load %arg7[%15, %c0_6] : memref<16x256xf32, #tpu.memory_space<vmem>>, vector<16x128xf32>
      tpu.vector_store %arg7[%15, %c0_6], %14 {strides = array<i32>} : memref<16x256xf32, #tpu.memory_space<vmem>>, vector<16x128xf32>,
    } else {
    }
    %c1_i32 = arith.constant 1 : i32
    %7 = arith.cmpi eq, %arg0, %c1_i32 : i32
    %8 = arith.extui %7 : i1 to i32
    %c0_i32_1 = arith.constant 0 : i32
    %9 = arith.cmpi ne, %8, %c0_i32_1 : i32
    scf.if %9 {
      %c0_4 = arith.constant 0 : index
      %c0_5 = arith.constant 0 : index
      %13 = vector.load %arg7[%c0_4, %c0_5] : memref<16x256xf32, #tpu.memory_space<vmem>>, vector<16x128xf32>
      %14 = arith.index_cast %1 : i32 to index
      %c0_6 = arith.constant 0 : index
      %15 = vector.load %arg2[%14, %c0_6] : memref<16x128xf32, #tpu.memory_space<vmem>>, vector<16x128xf32>
      %cst = arith.constant dense<0.000000e+00> : vector<16x128xf32>
      %16 = tpu.matmul %3, %13, %cst {dimension_numbers = #tpu.dot_dimension_numbers<[1], [0], [0], [1], [0, 0, 1, 1], [], []>} : vector<16x16xf32>, vector<16x128xf32>, vector<16x128xf32> -> vector<16x128xf32>
      %cst_7 = arith.constant 2.000000e+00 : f32
      %17 = vector.broadcast %cst_7 : f32 to vector<16x128xf32>
      %18 = arith.mulf %17, %16 : vector<16x128xf32>
      %19 = arith.subf %18, %15 : vector<16x128xf32>
      %20 = arith.index_cast %1 : i32 to index
      %c128 = arith.constant 128 : index
      %21 = vector.load %arg7[%20, %c128] : memref<16x256xf32, #tpu.memory_space<vmem>>, vector<16x128xf32>
      tpu.vector_store %arg7[%20, %c128], %19 {strides = array<i32>} : memref<16x256xf32, #tpu.memory_space<vmem>>, vector<16x128xf32>,
    } else {
    }
    %c1_i32_2 = arith.constant 1 : i32
    %10 = arith.cmpi eq, %arg0, %c1_i32_2 : i32
    %11 = arith.extui %10 : i1 to i32
    %c0_i32_3 = arith.constant 0 : i32
    %12 = arith.cmpi ne, %11, %c0_i32_3 : i32
    scf.if %12 {
      %13 = arith.index_cast %1 : i32 to index
      %c0_4 = arith.constant 0 : index
      %14 = vector.load %arg2[%13, %c0_4] : memref<16x128xf32, #tpu.memory_space<vmem>>, vector<16x128xf32>
      %c0_5 = arith.constant 0 : index
      %c0_6 = arith.constant 0 : index
      %15 = vector.load %arg4[%c0_5, %c0_6] : memref<384x128xf32, #tpu.memory_space<vmem>>, vector<128x128xf32>
      %cst = arith.constant dense<0.000000e+00> : vector<16x128xf32>
      %16 = tpu.matmul %14, %15, %cst {dimension_numbers = #tpu.dot_dimension_numbers<[1], [0], [0], [1], [0, 0, 1, 1], [], []>} : vector<16x128xf32>, vector<128x128xf32>, vector<16x128xf32> -> vector<16x128xf32>
      %17 = arith.index_cast %1 : i32 to index
      %c0_7 = arith.constant 0 : index
      %18 = vector.load %arg7[%17, %c0_7] : memref<16x256xf32, #tpu.memory_space<vmem>>, vector<16x256xf32>
      %c128 = arith.constant 128 : index
      %c0_8 = arith.constant 0 : index
      %19 = vector.load %arg4[%c128, %c0_8] : memref<384x128xf32, #tpu.memory_space<vmem>>, vector<256x128xf32>
      %cst_9 = arith.constant dense<0.000000e+00> : vector<16x128xf32>
      %20 = tpu.matmul %18, %19, %cst_9 {dimension_numbers = #tpu.dot_dimension_numbers<[1], [0], [0], [1], [0, 0, 1, 1], [], []>} : vector<16x256xf32>, vector<256x128xf32>, vector<16x128xf32> -> vector<16x128xf32>
      %21 = arith.addf %16, %20 : vector<16x128xf32>
      %c0_10 = arith.constant 0 : index
      %c0_11 = arith.constant 0 : index
      %22 = vector.load %arg5[%c0_10, %c0_11] : memref<1x128xf32, #tpu.memory_space<vmem>>, vector<1x128xf32>
      %23 = vector.broadcast %22 : vector<1x128xf32> to vector<16x128xf32>
      %24 = arith.addf %21, %23 : vector<16x128xf32>
      %25 = arith.index_cast %1 : i32 to index
      %c0_12 = arith.constant 0 : index
      %26 = vector.load %arg6[%25, %c0_12] : memref<16x128xf32, #tpu.memory_space<vmem>>, vector<16x128xf32>
      tpu.vector_store %arg6[%25, %c0_12], %24 {strides = array<i32>} : memref<16x128xf32, #tpu.memory_space<vmem>>, vector<16x128xf32>,
    } else {
    }
    return
  }
  func.func @transform_0(%arg0: i32, %arg1: i32) -> (i32, i32) {
    %c0_i32 = arith.constant 0 : i32
    %c0_i32_0 = arith.constant 0 : i32
    %c0_i32_1 = arith.constant 0 : i32
    return %c0_i32, %c0_i32_0 : i32, i32
  }
  func.func @transform_1(%arg0: i32, %arg1: i32) -> (i32, i32) {
    %c0_i32 = arith.constant 0 : i32
    %c0_i32_0 = arith.constant 0 : i32
    %c0_i32_1 = arith.constant 0 : i32
    return %c0_i32, %c0_i32_0 : i32, i32
  }
  func.func @transform_2(%arg0: i32, %arg1: i32) -> (i32, i32) {
    %c0_i32 = arith.constant 0 : i32
    %c0_i32_0 = arith.constant 0 : i32
    %c0_i32_1 = arith.constant 0 : i32
    return %c0_i32, %c0_i32_0 : i32, i32
  }
  func.func @transform_3(%arg0: i32, %arg1: i32) -> (i32, i32) {
    %c0_i32 = arith.constant 0 : i32
    %c0_i32_0 = arith.constant 0 : i32
    %c0_i32_1 = arith.constant 0 : i32
    return %c0_i32, %c0_i32_0 : i32, i32
  }
  func.func @transform_4(%arg0: i32, %arg1: i32) -> (i32, i32) {
    %c0_i32 = arith.constant 0 : i32
    %c0_i32_0 = arith.constant 0 : i32
    %c0_i32_1 = arith.constant 0 : i32
    return %c0_i32, %c0_i32_0 : i32, i32
  }
}

module attributes {stable_mosaic.version = 11 : i64} {
  func.func @_cheb_kernel(%arg0: i32, %arg1: i32, %arg2: memref<16x128xf32, #tpu.memory_space<vmem>>, %arg3: memref<16x16xf32, #tpu.memory_space<vmem>>, %arg4: memref<384x128xf32, #tpu.memory_space<vmem>>, %arg5: memref<1x128xf32, #tpu.memory_space<vmem>>, %arg6: memref<16x128xf32, #tpu.memory_space<vmem>>, %arg7: memref<16x256xf32, #tpu.memory_space<vmem>>) attributes {dimension_semantics = [#tpu.dimension_semantics<arbitrary>, #tpu.dimension_semantics<arbitrary>], iteration_bounds = array<i64: 2, 1>, scalar_prefetch = 0 : i64, scratch_operands = 1 : i64, tpu.core_type = #tpu.core_type<tc>, window_params = [{pipeline_mode = #tpu.pipeline_mode<synchronous>, transform_indices = @transform_0, window_bounds = array<i64: 16, 128>}, {pipeline_mode = #tpu.pipeline_mode<synchronous>, transform_indices = @transform_1, window_bounds = array<i64: 16, 16>}, {pipeline_mode = #tpu.pipeline_mode<synchronous>, transform_indices = @transform_2, window_bounds = array<i64: 384, 128>}, {pipeline_mode = #tpu.pipeline_mode<synchronous>, transform_indices = @transform_3, window_bounds = array<i64: 1, 128>}, {pipeline_mode = #tpu.pipeline_mode<synchronous>, transform_indices = @transform_4, window_bounds = array<i64: 16, 128>}]} {
    %c16_i32 = arith.constant 16 : i32
    %0 = arith.muli %arg1, %c16_i32 : i32
    %1 = tpu.assume_multiple %0, 16 : i32
    %2 = arith.index_cast %1 : i32 to index
    %c0 = arith.constant 0 : index
    %3 = vector.load %arg3[%2, %c0] : memref<16x16xf32, #tpu.memory_space<vmem>>, vector<16x16xf32>
    %c0_i32 = arith.constant 0 : i32
    %4 = arith.cmpi eq, %arg0, %c0_i32 : i32
    %5 = arith.extui %4 : i1 to i32
    %c0_i32_0 = arith.constant 0 : i32
    %6 = arith.cmpi ne, %5, %c0_i32_0 : i32
    scf.if %6 {
      %c0_4 = arith.constant 0 : index
      %c0_5 = arith.constant 0 : index
      %13 = vector.load %arg2[%c0_4, %c0_5] : memref<16x128xf32, #tpu.memory_space<vmem>>, vector<16x128xf32>
      %cst = arith.constant dense<0.000000e+00> : vector<16x128xf32>
      %14 = tpu.matmul %3, %13, %cst {dimension_numbers = #tpu.dot_dimension_numbers<[1], [0], [0], [1], [0, 0, 1, 1], [], []>} : vector<16x16xf32>, vector<16x128xf32>, vector<16x128xf32> -> vector<16x128xf32>
      %15 = arith.index_cast %1 : i32 to index
      %c0_6 = arith.constant 0 : index
      %16 = vector.load %arg7[%15, %c0_6] : memref<16x256xf32, #tpu.memory_space<vmem>>, vector<16x128xf32>
      tpu.vector_store %arg7[%15, %c0_6], %14 {strides = array<i32>} : memref<16x256xf32, #tpu.memory_space<vmem>>, vector<16x128xf32>,
    } else {
    }
    %c1_i32 = arith.constant 1 : i32
    %7 = arith.cmpi eq, %arg0, %c1_i32 : i32
    %8 = arith.extui %7 : i1 to i32
    %c0_i32_1 = arith.constant 0 : i32
    %9 = arith.cmpi ne, %8, %c0_i32_1 : i32
    scf.if %9 {
      %c0_4 = arith.constant 0 : index
      %c0_5 = arith.constant 0 : index
      %13 = vector.load %arg7[%c0_4, %c0_5] : memref<16x256xf32, #tpu.memory_space<vmem>>, vector<16x128xf32>
      %14 = arith.index_cast %1 : i32 to index
      %c0_6 = arith.constant 0 : index
      %15 = vector.load %arg2[%14, %c0_6] : memref<16x128xf32, #tpu.memory_space<vmem>>, vector<16x128xf32>
      %cst = arith.constant dense<0.000000e+00> : vector<16x128xf32>
      %16 = tpu.matmul %3, %13, %cst {dimension_numbers = #tpu.dot_dimension_numbers<[1], [0], [0], [1], [0, 0, 1, 1], [], []>} : vector<16x16xf32>, vector<16x128xf32>, vector<16x128xf32> -> vector<16x128xf32>
      %cst_7 = arith.constant 2.000000e+00 : f32
      %17 = vector.broadcast %cst_7 : f32 to vector<16x128xf32>
      %18 = arith.mulf %17, %16 : vector<16x128xf32>
      %19 = arith.subf %18, %15 : vector<16x128xf32>
      %20 = arith.index_cast %1 : i32 to index
      %c128 = arith.constant 128 : index
      %21 = vector.load %arg7[%20, %c128] : memref<16x256xf32, #tpu.memory_space<vmem>>, vector<16x128xf32>
      tpu.vector_store %arg7[%20, %c128], %19 {strides = array<i32>} : memref<16x256xf32, #tpu.memory_space<vmem>>, vector<16x128xf32>,
    } else {
    }
    %c1_i32_2 = arith.constant 1 : i32
    %10 = arith.cmpi eq, %arg0, %c1_i32_2 : i32
    %11 = arith.extui %10 : i1 to i32
    %c0_i32_3 = arith.constant 0 : i32
    %12 = arith.cmpi ne, %11, %c0_i32_3 : i32
    scf.if %12 {
      %13 = arith.index_cast %1 : i32 to index
      %c0_4 = arith.constant 0 : index
      %14 = vector.load %arg2[%13, %c0_4] : memref<16x128xf32, #tpu.memory_space<vmem>>, vector<16x128xf32>
      %c0_5 = arith.constant 0 : index
      %c0_6 = arith.constant 0 : index
      %15 = vector.load %arg4[%c0_5, %c0_6] : memref<384x128xf32, #tpu.memory_space<vmem>>, vector<128x128xf32>
      %cst = arith.constant dense<0.000000e+00> : vector<16x128xf32>
      %16 = tpu.matmul %14, %15, %cst {dimension_numbers = #tpu.dot_dimension_numbers<[1], [0], [0], [1], [0, 0, 1, 1], [], []>} : vector<16x128xf32>, vector<128x128xf32>, vector<16x128xf32> -> vector<16x128xf32>
      %17 = arith.index_cast %1 : i32 to index
      %c0_7 = arith.constant 0 : index
      %18 = vector.load %arg7[%17, %c0_7] : memref<16x256xf32, #tpu.memory_space<vmem>>, vector<16x256xf32>
      %c128 = arith.constant 128 : index
      %c0_8 = arith.constant 0 : index
      %19 = vector.load %arg4[%c128, %c0_8] : memref<384x128xf32, #tpu.memory_space<vmem>>, vector<256x128xf32>
      %cst_9 = arith.constant dense<0.000000e+00> : vector<16x128xf32>
      %20 = tpu.matmul %18, %19, %cst_9 {dimension_numbers = #tpu.dot_dimension_numbers<[1], [0], [0], [1], [0, 0, 1, 1], [], []>} : vector<16x256xf32>, vector<256x128xf32>, vector<16x128xf32> -> vector<16x128xf32>
      %21 = arith.addf %16, %20 : vector<16x128xf32>
      %c0_10 = arith.constant 0 : index
      %c0_11 = arith.constant 0 : index
      %22 = vector.load %arg5[%c0_10, %c0_11] : memref<1x128xf32, #tpu.memory_space<vmem>>, vector<1x128xf32>
      %23 = vector.broadcast %22 : vector<1x128xf32> to vector<16x128xf32>
      %24 = arith.addf %21, %23 : vector<16x128xf32>
      %25 = arith.index_cast %1 : i32 to index
      %c0_12 = arith.constant 0 : index
      %26 = vector.load %arg6[%25, %c0_12] : memref<16x128xf32, #tpu.memory_space<vmem>>, vector<16x128xf32>
      tpu.vector_store %arg6[%25, %c0_12], %24 {strides = array<i32>} : memref<16x128xf32, #tpu.memory_space<vmem>>, vector<16x128xf32>,
    } else {
    }
    return
  }
  func.func @transform_0(%arg0: i32, %arg1: i32) -> (i32, i32) {
    %c0_i32 = arith.constant 0 : i32
    %c0_i32_0 = arith.constant 0 : i32
    %c0_i32_1 = arith.constant 0 : i32
    return %c0_i32, %c0_i32_0 : i32, i32
  }
  func.func @transform_1(%arg0: i32, %arg1: i32) -> (i32, i32) {
    %c0_i32 = arith.constant 0 : i32
    %c0_i32_0 = arith.constant 0 : i32
    %c0_i32_1 = arith.constant 0 : i32
    return %c0_i32, %c0_i32_0 : i32, i32
  }
  func.func @transform_2(%arg0: i32, %arg1: i32) -> (i32, i32) {
    %c0_i32 = arith.constant 0 : i32
    %c0_i32_0 = arith.constant 0 : i32
    %c0_i32_1 = arith.constant 0 : i32
    return %c0_i32, %c0_i32_0 : i32, i32
  }
  func.func @transform_3(%arg0: i32, %arg1: i32) -> (i32, i32) {
    %c0_i32 = arith.constant 0 : i32
    %c0_i32_0 = arith.constant 0 : i32
    %c0_i32_1 = arith.constant 0 : i32
    return %c0_i32, %c0_i32_0 : i32, i32
  }
  func.func @transform_4(%arg0: i32, %arg1: i32) -> (i32, i32) {
    %c0_i32 = arith.constant 0 : i32
    %c0_i32_0 = arith.constant 0 : i32
    %c0_i32_1 = arith.constant 0 : i32
    return %c0_i32, %c0_i32_0 : i32, i32
  }
}

</mosaic_0001>

<bundles_post_ra>
// kernel: tpu_custom_call.1
= control target key start
LH: loop header
LB: loop body
LE: loop exit
PB: predicated region body
PF: predicated region fallthrough
CT: control target
= control target key end

     0   :  { %9 = vsyncpa [#allocation4], 0  ;;  %s1356_s0 = inlined_call_operand.hbm [shape: f32[16,128], index: 0, kind: input, shape index: {}]   ;;  %s1357_s1 = inlined_call_operand.hbm [shape: f32[16,16], index: 1, kind: input, shape index: {}]   ;;  %s1358_s2 = inlined_call_operand.hbm [shape: f32[384,128], index: 2, kind: input, shape index: {}]   ;;  %s1359_s3 = inlined_call_operand.vmem [shape: f32[1,128], index: 3, kind: input, shape index: {}]   ;;  %s1360_s4 = inlined_call_operand.hbm [shape: f32[16,128], index: 4, kind: output, shape index: {}]  }
   0x1   :  { %10 = vsyncpa [#allocation7], 0 }
   0x2   :  { %11 = vsyncpa [#allocation5], 0  ;;  %s1173_s15 = smov 0   ;;  %s1175_s16 = smov 0  }
   0x3   :  { %s1177_s17 = smov 0  }
   0x4 LB: > { %s723_s18 = sadd.s32 4294967295, %s1138_s17   ;;  %p724_p0 = scmp.ge.s32.totalorder %s1138_s17, 1  ;;  %s1138_s17 = sphi %s1177_s17, %s17_s17   ;;  %s1134_s16 = sphi %s1175_s16, %s1373_s16   ;;  %s1130_s15 = sphi %s1173_s15, %s1372_s15  }
   0x5   : > { %p139_p1 = scmp.lt.s32.totalorder %s1138_s17, 3  ;;  %p1193_p2 = scmp.eq.s32.totalorder %s723_s18, 0 }
   0x6   : > { %s1140_s21 = smov [#allocation6]   ;;  %s29_s24 = sadd.s32 1, %s1134_s16 }
   0x7   : > { %s1364_s19 = scalar_select %p1193_p2, 1, 0 }
   0x8   : > { %p1197_p3 = pnand %p724_p0, %p139_p1  ;;  %s164_s22 = sshll.u32 %s1140_s21, 4  ;;  %s1201_s22 = int_to_ptr.vmem [resolvable:$true] %s164_s22 }
   0x9   : > { %p1212_p6 = scmp.ge.s32.totalorder %s29_s24, 2  ;;  %s1141_s26 = smov [#allocation3]  }
   0xa   : > { %s1365_s20 = scalar_select %p1197_p3, 1, 0 }
   0xb   : > { %p944_p4 = pneg %p1197_p3  ;;  %s151_s27 = sshll.u32 %s1141_s26, 4  ;;  %s152_s27 = int_to_ptr.vmem [resolvable:$true] %s151_s27 }
   0xc   : > { %s994_s30 = scalar_lea.hbm %s1357_s1, 256 }
   0xd   : > { %p1207_p5 = pnand %p1193_p2, %p944_p4  ;;  %p995_p7 = scmp.ne.s32.totalorder %s1357_s1, %s994_s30 }
   0xe   : > { %p1001_p11 = scmp.lt.u32.totalorder %s994_s30, %s1357_s1 }
   0xf   : > { %p1224_p8 = pneg %p1207_p5 }
  0x11   : > { %p997_p9 = pnand %p1224_p8, %p995_p7 }
  0x13   : > { %p998_p10 = pneg %p997_p9 }
  0x15   : > { %p1003_p12 = pnand %p1001_p11, %p998_p10 }
  0x17   : > { %1006 = shalt.err (!%p1003_p12)
}
  0x18   : > { %s1007_s10 = scalar_lea.vmem %s1201_s22, 256  ;;  %p1015_p4 = scmp.lt.s32.totalorder %s1201_s22, %s1201_s22 }
  0x19   : > { %p1008_p13 = scmp.ne.s32.totalorder %s1201_s22, %s1007_s10  ;;  %p1016_p2 = scmp.lt.s32.totalorder %s1007_s10, %s1007_s10 }
  0x1b   : > { %p1010_p0 = pnand %p1008_p13, %p1224_p8  ;;  %p1017_p7 = por %p1016_p2, %p1015_p4 }
  0x1d   : > { %p1011_p1 = pneg %p1010_p0 }
  0x1f   : > { %p1018_p9 = pnand %p1017_p7, %p1011_p1 }
  0x21   : > { %1021 = shalt.err (!%p1018_p9)
}
  0x22   : > { %s1142_s11 = smov 128   ;;  %s1143_s12 = smov 8  }
  0x23   : > { %950 = dma.hbm_to_vmem [thread:$0]  (!%p1207_p5), %s1357_s1, 256, %s1201_s22, [#allocation7], %s1142_s11, %s1142_s11, %s1143_s12  }
  0x24   : > { %s1375_s24 = smov (%p1212_p6, %s29_s24), 0  ;;  %s1022_s28 = scalar_lea.hbm %s1356_s0, 256 }
  0x25   : > { %p1023_p2 = scmp.ne.s32.totalorder %s1356_s0, %s1022_s28  ;;  %p1029_p12 = scmp.lt.u32.totalorder %s1022_s28, %s1356_s0 }
  0x27   : > { %p1025_p10 = pnand %p1023_p2, %p1224_p8 }
  0x29   : > { %p1026_p11 = pneg %p1025_p10 }
  0x2b   : > { %p1031_p13 = pnand %p1029_p12, %p1026_p11 }
  0x2d   : > { %1034 = shalt.err (!%p1031_p13)
}
  0x2e   : > { %s1035_s22 = scalar_lea.vmem %s152_s27, 256  ;;  %p1043_p4 = scmp.lt.s32.totalorder %s152_s27, %s152_s27 }
  0x2f   : > { %p1036_p6 = scmp.ne.s32.totalorder %s152_s27, %s1035_s22  ;;  %p1044_p7 = scmp.lt.s32.totalorder %s1035_s22, %s1035_s22 }
  0x31   : > { %p1038_p0 = pnand %p1036_p6, %p1224_p8  ;;  %p1045_p9 = por %p1044_p7, %p1043_p4 }
  0x33   : > { %p1039_p1 = pneg %p1038_p0 }
  0x35   : > { %p1046_p3 = pnand %p1045_p9, %p1039_p1 }
  0x37   : > { %1049 = shalt.err (!%p1046_p3)
}
  0x38   : > { %947 = dma.hbm_to_vmem [thread:$0]  (!%p1207_p5), %s1356_s0, 256, %s152_s27, [#allocation4], %s1142_s11, %s1142_s11, %s1143_s12  }
  0x39   : > { %s1144_s9 = smov [#allocation8]   ;;  %s1050_s21 = scalar_lea.hbm %s1358_s2, 6144 }
  0x3a   : > { %s177_s10 = sshll.u32 %s1144_s9, 4  ;;  %p1051_p3 = scmp.ne.s32.totalorder %s1358_s2, %s1050_s21  ;;  %s178_s10 = int_to_ptr.vmem [resolvable:$true] %s177_s10 }
  0x3b   : > { %p1057_p11 = scmp.lt.u32.totalorder %s1050_s21, %s1358_s2 }
  0x3c   : > { %p1053_p2 = pnand %p1051_p3, %p1224_p8 }
  0x3e   : > { %p1054_p10 = pneg %p1053_p2 }
  0x40   : > { %p1059_p12 = pnand %p1057_p11, %p1054_p10 }
  0x42   : > { %1062 = shalt.err (!%p1059_p12)
}
  0x43   : > { %s1063_s27 = scalar_lea.vmem %s178_s10, 6144  ;;  %p1071_p1 = scmp.lt.s32.totalorder %s178_s10, %s178_s10 }
  0x44   : > { %p1064_p13 = scmp.ne.s32.totalorder %s178_s10, %s1063_s27  ;;  %p1072_p4 = scmp.lt.s32.totalorder %s1063_s27, %s1063_s27 }
  0x46   : > { %p1066_p6 = pnand %p1064_p13, %p1224_p8  ;;  %p1073_p7 = por %p1072_p4, %p1071_p1 }
  0x48   : > { %p1067_p0 = pneg %p1066_p6 }
  0x4a   : > { %p1074_p9 = pnand %p1073_p7, %p1067_p0 }
  0x4c   : > { %1077 = shalt.err (!%p1074_p9)
}
  0x4d   : > { %953 = dma.hbm_to_vmem [thread:$0]  (!%p1207_p5), %s1358_s2, 6144, %s178_s10, [#allocation7], %s1142_s11, %s1142_s11, %s1143_s12  }
  0x4e   : > { %p1369_p3 = scmp.ne.s32.totalorder %s1365_s20, 0 }
  0x4f   : > { %p1370_p8 = scmp.ne.s32.totalorder (!%p1369_p3), %s1364_s19, 0 }
  0x50   : > { %196 = sbr.rel (%p1369_p3) target bundleno = 793 (0x319), region = 36 }
  0x57   : > { %1117 = dma.done.wait (%p1370_p8), [#allocation4], 256  }
  0x58   : > { %1119 = vsyncadd (%p1370_p8), [#allocation4], 4294967040 }
  0x59   : > { %1121 = dma.done.wait (%p1370_p8), [#allocation7], 6400  }
  0x5a   : > { %1123 = vsyncadd (%p1370_p8), [#allocation7], 4294960896  ;;  %v222_v0 = vld [vmem:[#allocation6] sm:$0xff]  ;;  %v223_v1 = vld [vmem:[#allocation6 + $0x8] sm:$0xff]  ;;  %p732_p2 = scmp.ne.s32.totalorder %s1130_s15, 0 }
  0x5b   : > { %v228_v2 = vld [vmem:[#allocation3] sm:$0xff] (!%p732_p2)  ;;  %v229_v3 = vld [vmem:[#allocation3 + $0x8] sm:$0xff] (!%p732_p2)  ;;  %vm230_vm0 = vcmask (!%p732_p2), 130048  }
  0x5c   : > { %227 = sbr.rel (%p732_p2) target bundleno = 312 (0x138), region = 52  ;;  %v856_v4 = vpack.c.bf16 (!%p732_p2), %v229_v3, %v228_v2  ;;  %811 = vmatprep.mubr.msk.f32.mxu0 (!%p732_p2), %vm230_vm0, %v222_v0 }
  0x5e   : > { %857 = vmatprep.subr.bf16.mxu0 (!%p732_p2), %v856_v4 }
  0x5f   : > { %859 = vmatpush3.bf16.msra.mxu0 (!%p732_p2), %v856_v4 }
  0x62   : > { %812 = vmatmul.mubr.msk.f32.vlgmr.msra.gmra.mrb[0].mxu0 (!%p732_p2), %vm230_vm0, %v223_v1 }
 0x135   : > { %v813_v5 = vpop.f32.mrb[0].mxu0 }
 0x136   : > { %318 = vst [vmem:[#allocation2 + $0x10] sm:$0xff] %v813_v5  ;;  %v303_v6 = vpop.f32.mrb[1].mxu0 }
 0x137   : > { %317 = vst [vmem:[#allocation2] sm:$0xff] %v303_v6 }
 0x138 PF: > { %p735_p5 = scmp.ne.s32.totalorder %s1130_s15, 1 }
 0x139   : > { %vm328_vm1 = vcmask (!%p735_p5), 130048   ;;  %v459_v9 = vld [vmem:[#allocation8 + $0x100] sm:$0xff] (!%p735_p5)  ;;  %v460_v11 = vld [vmem:[#allocation8 + $0x108] sm:$0xff] (!%p735_p5)  ;;  %v461_v18 = vld [vmem:[#allocation8 + $0x110] sm:$0xff] (!%p735_p5) }
 0x13a   : > { %322 = sbr.rel (%p735_p5) target bundleno = 767 (0x2ff), region = 56  ;;  %818 = vmatprep.mubr.msk.f32.mxu0 (!%p735_p5), %vm328_vm1, %v222_v0  ;;  %v443_v12 = vld [vmem:[#allocation8 + $0x80] sm:$0xff] (!%p735_p5)  ;;  %v444_v13 = vld [vmem:[#allocation8 + $0x88] sm:$0xff] (!%p735_p5)  ;;  %v864_v14 = vpack.c.bf16 (!%p735_p5), %v460_v11, %v459_v9  ;;  %v462_v20 = vld [vmem:[#allocation8 + $0x118] sm:$0xff] (!%p735_p5) }
 0x13b   : > { %v866_v15 = vpack.c.bf16 (!%p735_p5), %v444_v13, %v443_v12  ;;  %v423_v16 = vld [vmem:[#allocation8] sm:$0xff] (!%p735_p5)  ;;  %v424_v17 = vld [vmem:[#allocation8 + $0x8] sm:$0xff] (!%p735_p5)  ;;  %v445_v21 = vld [vmem:[#allocation8 + $0x90] sm:$0xff] (!%p735_p5)  ;;  %v868_v23 = vpack.c.bf16 (!%p735_p5), %v462_v20, %v461_v18 }
 0x13c   : > { %v896_v19 = vpack.c.bf16 (!%p735_p5), %v424_v17, %v423_v16  ;;  %v446_v22 = vld [vmem:[#allocation8 + $0x98] sm:$0xff] (!%p735_p5)  ;;  %865 = vmatprep.subr.bf16.mxu1 (!%p735_p5), %v864_v14  ;;  %v425_v24 = vld [vmem:[#allocation8 + $0x10] sm:$0xff] (!%p735_p5)  ;;  %v463_v26 = vld [vmem:[#allocation8 + $0x120] sm:$0xff] (!%p735_p5) }
 0x13d   : > { %v1308_v8 = vld [vmem:[#allocation2 + $0x10] sm:$0xff] (!%p735_p5)  ;;  %v426_v25 = vld [vmem:[#allocation8 + $0x18] sm:$0xff] (!%p735_p5)  ;;  %867 = vmatpush3.bf16.msra.mxu1 (!%p735_p5), %v866_v15  ;;  %v870_v27 = vpack.c.bf16 (!%p735_p5), %v446_v22, %v445_v21  ;;  %v464_v29 = vld [vmem:[#allocation8 + $0x128] sm:$0xff] (!%p735_p5) }
 0x13e   : > { %v1306_v7 = vld [vmem:[#allocation2] sm:$0xff] (!%p735_p5)  ;;  %v900_v28 = vpack.c.bf16 (!%p735_p5), %v426_v25, %v425_v24  ;;  %869 = vmatprep.subr.bf16.mxu1 (!%p735_p5), %v868_v23  ;;  %v872_v31 = vpack.c.bf16 (!%p735_p5), %v464_v29, %v463_v26  ;;  %v448_v32 = vld [vmem:[#allocation8 + $0xa8] sm:$0xff] (!%p735_p5)  ;;  %v465_v35 = vld [vmem:[#allocation8 + $0x130] sm:$0xff] (!%p735_p5) }
 0x13f   : > { %v860_v10 = vpack.c.bf16 (!%p735_p5), %v1308_v8, %v1306_v7  ;;  %v447_v30 = vld [vmem:[#allocation8 + $0xa0] sm:$0xff] (!%p735_p5)  ;;  %v428_v34 = vld [vmem:[#allocation8 + $0x28] sm:$0xff] (!%p735_p5)  ;;  %v466_v36 = vld [vmem:[#allocation8 + $0x138] sm:$0xff] (!%p735_p5) }
 0x140   : > { %v427_v33 = vld [vmem:[#allocation8 + $0x20] sm:$0xff] (!%p735_p5)  ;;  %v874_v37 = vpack.c.bf16 (!%p735_p5), %v448_v32, %v447_v30  ;;  %v449_v39 = vld [vmem:[#allocation8 + $0xb0] sm:$0xff] (!%p735_p5)  ;;  %v876_v40 = vpack.c.bf16 (!%p735_p5), %v466_v36, %v465_v35  ;;  %v450_v41 = vld [vmem:[#allocation8 + $0xb8] sm:$0xff] (!%p735_p5) }
 0x141   : > { %861 = vmatprep.subr.bf16.mxu0 %v860_v10  ;;  %871 = vmatpush3.bf16.msra.mxu1 %v870_v27  ;;  %v904_v38 = vpack.c.bf16 %v428_v34, %v427_v33  ;;  %v429_v42 = vld [vmem:[#allocation8 + $0x30] sm:$0xff]  ;;  %v430_v43 = vld [vmem:[#allocation8 + $0x38] sm:$0xff]  ;;  %v467_v44 = vld [vmem:[#allocation8 + $0x140] sm:$0xff]  ;;  %v878_v46 = vpack.c.bf16 %v450_v41, %v449_v39 }
 0x142   : > { %863 = vmatpush3.bf16.msra.mxu0 %v860_v10  ;;  %873 = vmatprep.subr.bf16.mxu1 %v872_v31  ;;  %v468_v45 = vld [vmem:[#allocation8 + $0x148] sm:$0xff]  ;;  %v908_v47 = vpack.c.bf16 %v430_v43, %v429_v42  ;;  %v451_v49 = vld [vmem:[#allocation8 + $0xc0] sm:$0xff]  ;;  %v469_v55 = vld [vmem:[#allocation8 + $0x150] sm:$0xff] }
 0x143   : > { %897 = vmatprep.subr.bf16.mxu0 %v896_v19  ;;  %v880_v48 = vpack.c.bf16 %v468_v45, %v467_v44  ;;  %v452_v50 = vld [vmem:[#allocation8 + $0xc8] sm:$0xff]  ;;  %v431_v52 = vld [vmem:[#allocation8 + $0x40] sm:$0xff]  ;;  %v470_v56 = vld [vmem:[#allocation8 + $0x158] sm:$0xff] }
 0x144   : > { %v882_v51 = vpack.c.bf16 %v452_v50, %v451_v49  ;;  %v432_v53 = vld [vmem:[#allocation8 + $0x48] sm:$0xff]  ;;  %v884_v57 = vpack.c.bf16 %v470_v56, %v469_v55  ;;  %v453_v58 = vld [vmem:[#allocation8 + $0xd0] sm:$0xff]  ;;  %v454_v59 = vld [vmem:[#allocation8 + $0xd8] sm:$0xff] }
 0x145   : > { %819 = vmatmul.mubr.msk.f32.vlgmr.msra.gmra.mrb[0].mxu0 %vm328_vm1, %v223_v1  ;;  %875 = vmatpush3.bf16.msra.mxu1 %v874_v37  ;;  %v912_v54 = vpack.c.bf16 %v432_v53, %v431_v52  ;;  %v886_v60 = vpack.c.bf16 %v454_v59, %v453_v58  ;;  %v433_v61 = vld [vmem:[#allocation8 + $0x50] sm:$0xff]  ;;  %v434_v62 = vld [vmem:[#allocation8 + $0x58] sm:$0xff]  ;;  %v471_v0 = vld [vmem:[#allocation8 + $0x160] sm:$0xff] }
 0x146   : > { %899 = vmatpush3.bf16.msra.mxu0 %v896_v19  ;;  %877 = vmatprep.subr.bf16.mxu1 %v876_v40  ;;  %v916_v63 = vpack.c.bf16 %v434_v62, %v433_v61  ;;  %v472_v1 = vld [vmem:[#allocation8 + $0x168] sm:$0xff]  ;;  %v455_v3 = vld [vmem:[#allocation8 + $0xe0] sm:$0xff]  ;;  %v473_v11 = vld [vmem:[#allocation8 + $0x170] sm:$0xff] }
 0x147   : > { %901 = vmatprep.subr.bf16.mxu0 %v900_v28  ;;  %v888_v2 = vpack.c.bf16 %v472_v1, %v471_v0  ;;  %v456_v4 = vld [vmem:[#allocation8 + $0xe8] sm:$0xff]  ;;  %v435_v6 = vld [vmem:[#allocation8 + $0x60] sm:$0xff]  ;;  %v474_v12 = vld [vmem:[#allocation8 + $0x178] sm:$0xff] }
 0x148   : > { %v890_v5 = vpack.c.bf16 %v456_v4, %v455_v3  ;;  %v436_v9 = vld [vmem:[#allocation8 + $0x68] sm:$0xff]  ;;  %v892_v13 = vpack.c.bf16 %v474_v12, %v473_v11  ;;  %v457_v14 = vld [vmem:[#allocation8 + $0xf0] sm:$0xff]  ;;  %v458_v15 = vld [vmem:[#allocation8 + $0xf8] sm:$0xff] }
 0x149   : > { %879 = vmatpush3.bf16.msra.mxu1 %v878_v46  ;;  %v920_v10 = vpack.c.bf16 %v436_v9, %v435_v6  ;;  %v894_v16 = vpack.c.bf16 %v458_v15, %v457_v14  ;;  %v437_v17 = vld [vmem:[#allocation8 + $0x70] sm:$0xff]  ;;  %v438_v18 = vld [vmem:[#allocation8 + $0x78] sm:$0xff]  ;;  %v326_v19 = vld [vmem:[#allocation3] sm:$0xff] }
 0x14a   : > { %903 = vmatpush3.bf16.msra.mxu0 %v900_v28  ;;  %881 = vmatprep.subr.bf16.mxu1 %v880_v48  ;;  %v924_v20 = vpack.c.bf16 %v438_v18, %v437_v17  ;;  %v327_v21 = vld [vmem:[#allocation3 + $0x8] sm:$0xff]  ;;  %v738_v33 = vld [vmem:[%s1359_s3] ss:$0 sm:$0xff] }
 0x14b   : > { %905 = vmatprep.subr.bf16.mxu0 %v904_v38  ;;  %853 = vmatprep.mubr.f32.mxu0 %v326_v19 }
 0x14d   : > { %883 = vmatpush3.bf16.msra.mxu1 %v882_v51 }
 0x14e   : > { %907 = vmatpush3.bf16.msra.mxu0 %v904_v38  ;;  %885 = vmatprep.subr.bf16.mxu1 %v884_v57 }
 0x14f   : > { %909 = vmatprep.subr.bf16.mxu0 %v908_v47 }
 0x151   : > { %887 = vmatpush3.bf16.msra.mxu1 %v886_v60 }
 0x152   : > { %911 = vmatpush3.bf16.msra.mxu0 %v908_v47  ;;  %889 = vmatprep.subr.bf16.mxu1 %v888_v2 }
 0x153   : > { %913 = vmatprep.subr.bf16.mxu0 %v912_v54 }
 0x155   : > { %891 = vmatpush3.bf16.msra.mxu1 %v890_v5 }
 0x156   : > { %915 = vmatpush3.bf16.msra.mxu0 %v912_v54  ;;  %893 = vmatprep.subr.bf16.mxu1 %v892_v13 }
 0x157   : > { %917 = vmatprep.subr.bf16.mxu0 %v916_v63 }
 0x159   : > { %895 = vmatpush3.bf16.msra.mxu1 %v894_v16 }
 0x15a   : > { %919 = vmatpush3.bf16.msra.mxu0 %v916_v63 }
 0x15b   : > { %921 = vmatprep.subr.bf16.mxu0 %v920_v10 }
 0x15e   : > { %923 = vmatpush3.bf16.msra.mxu0 %v920_v10 }
 0x15f   : > { %925 = vmatprep.subr.bf16.mxu0 %v924_v20 }
 0x162   : > { %927 = vmatpush3.bf16.msra.mxu0 %v924_v20 }
 0x165   : > { %854 = vmatmul.mubr.f32.vlgmr.msra.gmra.mrb[2].mxu0 %v327_v21 }
 0x218   : > { %v820_v22 = vpop.f32.mrb[0].mxu0 }
 0x219   : > { %v411_v23 = vmul.f32 2.0, %v820_v22  ;;  %v401_v24 = vpop.f32.mrb[1].mxu0 }
 0x21a   : > { %v410_v25 = vmul.f32 2.0, %v401_v24 }
 0x21b   : > { %v413_v26 = vsub.f32 %v411_v23, %v327_v21 }
 0x21c   : > { %v412_v27 = vsub.f32 %v410_v25, %v326_v19 }
 0x21e   : > { %539 = vmatprep.mubr.f32.mxu1 %v412_v27 }
 0x21f   : > { %540 = vmatmul.mubr.f32.vlgmr.msra.gmra.mrb[0].mxu1 %v1306_v7 }
 0x220   : > { %544 = vmatprep.mubr.f32.mxu1 %v413_v26 }
 0x223   : > { %545 = vmatmul.mubr.f32.gmra.mrb[2].mxu1 %v1308_v8 }
 0x238   : > { %v855_v28 = vpop.f32.mrb[2].mxu0 }
 0x239   : > { %v616_v29 = vpop.f32.mrb[3].mxu0 }
 0x2f2   : > { %v783_v30 = vpop.f32.mrb[0].mxu1 }
 0x2f3   : > { %v784_v31 = vpop.f32.mrb[1].mxu1 }
 0x2f4   : > { %v785_v32 = vadd.f32 %v784_v31, %v783_v30 }
 0x2f6   : > { %v617_v34 = vadd.f32 %v785_v32, %v616_v29  ;;  %v786_v35 = vpop.f32.mrb[2].mxu1 }
 0x2f7   : > { %v787_v36 = vpop.f32.mrb[3].mxu1 }
 0x2f8   : > { %v632_v37 = vadd.f32 %v738_v33, %v617_v34  ;;  %v788_v38 = vadd.f32 %v787_v36, %v786_v35 }
 0x2fa   : > { %635 = vst [vmem:[#allocation9] sm:$0xff] %v632_v37  ;;  %v622_v39 = vadd.f32 %v855_v28, %v788_v38 }
 0x2fc   : > { %v633_v7 = vadd.f32 %v738_v33, %v622_v39 }
 0x2fe   : > { %636 = vst [vmem:[#allocation9 + $0x8] sm:$0xff] %v633_v7 }
 0x2ff PF: > { %p1321_p10 = scmp.eq.s32.totalorder %s723_s18, 1  ;;  %s1145_s23 = smov [#allocation9]  }
 0x300   : > { %s643_s7 = sshll.u32 %s1145_s23, 4  ;;  %s644_s7 = int_to_ptr.vmem [resolvable:$true] %s643_s7 }
 0x301   : > { %s1078_s11 = scalar_lea.vmem %s644_s7, 256  ;;  %p1085_p6 = scmp.lt.s32.totalorder %s644_s7, %s644_s7 }
 0x302   : > { %p1079_p11 = scmp.ne.s32.totalorder %s644_s7, %s1078_s11  ;;  %p1086_p0 = scmp.lt.s32.totalorder %s1078_s11, %s1078_s11 }
 0x304   : > { %p1080_p12 = pnand %p1079_p11, %p1321_p10  ;;  %p1087_p1 = por %p1086_p0, %p1085_p6 }
 0x306   : > { %p1081_p13 = pneg %p1080_p12 }
 0x308   : > { %p1088_p4 = pnand %p1087_p1, %p1081_p13 }
 0x30a   : > { %1091 = shalt.err (!%p1088_p4)
}
 0x30b   : > { %s1092_s18 = scalar_lea.hbm %s1360_s4, 256 }
 0x30c   : > { %p1093_p7 = scmp.ne.s32.totalorder %s1360_s4, %s1092_s18  ;;  %p1098_p8 = scmp.lt.u32.totalorder %s1092_s18, %s1360_s4 }
 0x30e   : > { %p1094_p9 = pnand %p1093_p7, %p1321_p10 }
 0x310   : > { %p1095_p3 = pneg %p1094_p9 }
 0x312   : > { %p1100_p2 = pnand %p1098_p8, %p1095_p3 }
 0x314   : > { %1103 = shalt.err (!%p1100_p2)
}
 0x315   : > { %s1146_s13 = smov 128   ;;  %s1147_s14 = smov 8  }
 0x316   : > { %941 = dma.vmem_to_hbm [thread:$0]  (%p1321_p10), %s644_s7, 256, %s1360_s4, [#allocation5], %s1146_s13, %s1146_s13, %s1147_s14  }
 0x317   : > { %1125 = dma.done.wait (%p1321_p10), [#allocation5], 256  }
 0x318   : > { %1127 = vsyncadd (%p1321_p10), [#allocation5], 4294967040 }
 0x319 PF: > { %s17_s17 = sadd.s32 1, %s1138_s17   ;;  %s1372_s15 = smov %s1134_s16 }
 0x31a   : > { %p14_p5 = scmp.ge.s32.totalorder %s17_s17, 4   ;;  %s1373_s16 = smov %s1375_s24 }
 0x31c   :  { %16 = sbr.rel (!%p14_p5) target bundleno = 4 (0x4), region = 86 }
 0x323   :  { %659 = vsyncpa [#allocation4], 1 }
 0x324   :  { %661 = vsyncpa [#allocation4 + $0x1], 1 }
 0x325   :  { %662 = vsyncpa [#allocation7], 1 }
 0x326   :  { %663 = vsyncpa [#allocation5], 1 }
 0x327   :  { %665 = vsyncpa [#allocation5 + $0x1], 1 }

// kernel: tpu_custom_call.1
= control target key start
LH: loop header
LB: loop body
LE: loop exit
PB: predicated region body
PF: predicated region fallthrough
CT: control target
= control target key end

     0   :  { %9 = vsyncpa [#allocation4], 0  ;;  %s1356_s0 = inlined_call_operand.hbm [shape: f32[16,128], index: 0, kind: input, shape index: {}]   ;;  %s1357_s1 = inlined_call_operand.hbm [shape: f32[16,16], index: 1, kind: input, shape index: {}]   ;;  %s1358_s2 = inlined_call_operand.hbm [shape: f32[384,128], index: 2, kind: input, shape index: {}]   ;;  %s1359_s3 = inlined_call_operand.vmem [shape: f32[1,128], index: 3, kind: input, shape index: {}]   ;;  %s1360_s4 = inlined_call_operand.hbm [shape: f32[16,128], index: 4, kind: output, shape index: {}]  }
   0x1   :  { %10 = vsyncpa [#allocation7], 0 }
   0x2   :  { %11 = vsyncpa [#allocation5], 0  ;;  %s1173_s15 = smov 0   ;;  %s1175_s16 = smov 0  }
   0x3   :  { %s1177_s17 = smov 0  }
   0x4 LB: > { %s723_s18 = sadd.s32 4294967295, %s1138_s17   ;;  %p724_p0 = scmp.ge.s32.totalorder %s1138_s17, 1  ;;  %s1138_s17 = sphi %s1177_s17, %s17_s17   ;;  %s1134_s16 = sphi %s1175_s16, %s1373_s16   ;;  %s1130_s15 = sphi %s1173_s15, %s1372_s15  }
   0x5   : > { %p139_p1 = scmp.lt.s32.totalorder %s1138_s17, 3  ;;  %p1193_p2 = scmp.eq.s32.totalorder %s723_s18, 0 }
   0x6   : > { %s1140_s21 = smov [#allocation6]   ;;  %s29_s24 = sadd.s32 1, %s1134_s16 }
   0x7   : > { %s1364_s19 = scalar_select %p1193_p2, 1, 0 }
   0x8   : > { %p1197_p3 = pnand %p724_p0, %p139_p1  ;;  %s164_s22 = sshll.u32 %s1140_s21, 4  ;;  %s1201_s22 = int_to_ptr.vmem [resolvable:$true] %s164_s22 }
   0x9   : > { %p1212_p6 = scmp.ge.s32.totalorder %s29_s24, 2  ;;  %s1141_s26 = smov [#allocation3]  }
   0xa   : > { %s1365_s20 = scalar_select %p1197_p3, 1, 0 }
   0xb   : > { %p944_p4 = pneg %p1197_p3  ;;  %s151_s27 = sshll.u32 %s1141_s26, 4  ;;  %s152_s27 = int_to_ptr.vmem [resolvable:$true] %s151_s27 }
   0xc   : > { %s994_s30 = scalar_lea.hbm %s1357_s1, 256 }
   0xd   : > { %p1207_p5 = pnand %p1193_p2, %p944_p4  ;;  %p995_p7 = scmp.ne.s32.totalorder %s1357_s1, %s994_s30 }
   0xe   : > { %p1001_p11 = scmp.lt.u32.totalorder %s994_s30, %s1357_s1 }
   0xf   : > { %p1224_p8 = pneg %p1207_p5 }
  0x11   : > { %p997_p9 = pnand %p1224_p8, %p995_p7 }
  0x13   : > { %p998_p10 = pneg %p997_p9 }
  0x15   : > { %p1003_p12 = pnand %p1001_p11, %p998_p10 }
  0x17   : > { %1006 = shalt.err (!%p1003_p12)
}
  0x18   : > { %s1007_s10 = scalar_lea.vmem %s1201_s22, 256  ;;  %p1015_p4 = scmp.lt.s32.totalorder %s1201_s22, %s1201_s22 }
  0x19   : > { %p1008_p13 = scmp.ne.s32.totalorder %s1201_s22, %s1007_s10  ;;  %p1016_p2 = scmp.lt.s32.totalorder %s1007_s10, %s1007_s10 }
  0x1b   : > { %p1010_p0 = pnand %p1008_p13, %p1224_p8  ;;  %p1017_p7 = por %p1016_p2, %p1015_p4 }
  0x1d   : > { %p1011_p1 = pneg %p1010_p0 }
  0x1f   : > { %p1018_p9 = pnand %p1017_p7, %p1011_p1 }
  0x21   : > { %1021 = shalt.err (!%p1018_p9)
}
  0x22   : > { %s1142_s11 = smov 128   ;;  %s1143_s12 = smov 8  }
  0x23   : > { %950 = dma.hbm_to_vmem [thread:$0]  (!%p1207_p5), %s1357_s1, 256, %s1201_s22, [#allocation7], %s1142_s11, %s1142_s11, %s1143_s12  }
  0x24   : > { %s1375_s24 = smov (%p1212_p6, %s29_s24), 0  ;;  %s1022_s28 = scalar_lea.hbm %s1356_s0, 256 }
  0x25   : > { %p1023_p2 = scmp.ne.s32.totalorder %s1356_s0, %s1022_s28  ;;  %p1029_p12 = scmp.lt.u32.totalorder %s1022_s28, %s1356_s0 }
  0x27   : > { %p1025_p10 = pnand %p1023_p2, %p1224_p8 }
  0x29   : > { %p1026_p11 = pneg %p1025_p10 }
  0x2b   : > { %p1031_p13 = pnand %p1029_p12, %p1026_p11 }
  0x2d   : > { %1034 = shalt.err (!%p1031_p13)
}
  0x2e   : > { %s1035_s22 = scalar_lea.vmem %s152_s27, 256  ;;  %p1043_p4 = scmp.lt.s32.totalorder %s152_s27, %s152_s27 }
  0x2f   : > { %p1036_p6 = scmp.ne.s32.totalorder %s152_s27, %s1035_s22  ;;  %p1044_p7 = scmp.lt.s32.totalorder %s1035_s22, %s1035_s22 }
  0x31   : > { %p1038_p0 = pnand %p1036_p6, %p1224_p8  ;;  %p1045_p9 = por %p1044_p7, %p1043_p4 }
  0x33   : > { %p1039_p1 = pneg %p1038_p0 }
  0x35   : > { %p1046_p3 = pnand %p1045_p9, %p1039_p1 }
  0x37   : > { %1049 = shalt.err (!%p1046_p3)
}
  0x38   : > { %947 = dma.hbm_to_vmem [thread:$0]  (!%p1207_p5), %s1356_s0, 256, %s152_s27, [#allocation4], %s1142_s11, %s1142_s11, %s1143_s12  }
  0x39   : > { %s1144_s9 = smov [#allocation8]   ;;  %s1050_s21 = scalar_lea.hbm %s1358_s2, 6144 }
  0x3a   : > { %s177_s10 = sshll.u32 %s1144_s9, 4  ;;  %p1051_p3 = scmp.ne.s32.totalorder %s1358_s2, %s1050_s21  ;;  %s178_s10 = int_to_ptr.vmem [resolvable:$true] %s177_s10 }
  0x3b   : > { %p1057_p11 = scmp.lt.u32.totalorder %s1050_s21, %s1358_s2 }
  0x3c   : > { %p1053_p2 = pnand %p1051_p3, %p1224_p8 }
  0x3e   : > { %p1054_p10 = pneg %p1053_p2 }
  0x40   : > { %p1059_p12 = pnand %p1057_p11, %p1054_p10 }
  0x42   : > { %1062 = shalt.err (!%p1059_p12)
}
  0x43   : > { %s1063_s27 = scalar_lea.vmem %s178_s10, 6144  ;;  %p1071_p1 = scmp.lt.s32.totalorder %s178_s10, %s178_s10 }
  0x44   : > { %p1064_p13 = scmp.ne.s32.totalorder %s178_s10, %s1063_s27  ;;  %p1072_p4 = scmp.lt.s32.totalorder %s1063_s27, %s1063_s27 }
  0x46   : > { %p1066_p6 = pnand %p1064_p13, %p1224_p8  ;;  %p1073_p7 = por %p1072_p4, %p1071_p1 }
  0x48   : > { %p1067_p0 = pneg %p1066_p6 }
  0x4a   : > { %p1074_p9 = pnand %p1073_p7, %p1067_p0 }
  0x4c   : > { %1077 = shalt.err (!%p1074_p9)
}
  0x4d   : > { %953 = dma.hbm_to_vmem [thread:$0]  (!%p1207_p5), %s1358_s2, 6144, %s178_s10, [#allocation7], %s1142_s11, %s1142_s11, %s1143_s12  }
  0x4e   : > { %p1369_p3 = scmp.ne.s32.totalorder %s1365_s20, 0 }
  0x4f   : > { %p1370_p8 = scmp.ne.s32.totalorder (!%p1369_p3), %s1364_s19, 0 }
  0x50   : > { %196 = sbr.rel (%p1369_p3) target bundleno = 793 (0x319), region = 36 }
  0x57   : > { %1117 = dma.done.wait (%p1370_p8), [#allocation4], 256  }
  0x58   : > { %1119 = vsyncadd (%p1370_p8), [#allocation4], 4294967040 }
  0x59   : > { %1121 = dma.done.wait (%p1370_p8), [#allocation7], 6400  }
  0x5a   : > { %1123 = vsyncadd (%p1370_p8), [#allocation7], 4294960896  ;;  %v222_v0 = vld [vmem:[#allocation6] sm:$0xff]  ;;  %v223_v1 = vld [vmem:[#allocation6 + $0x8] sm:$0xff]  ;;  %p732_p2 = scmp.ne.s32.totalorder %s1130_s15, 0 }
  0x5b   : > { %v228_v2 = vld [vmem:[#allocation3] sm:$0xff] (!%p732_p2)  ;;  %v229_v3 = vld [vmem:[#allocation3 + $0x8] sm:$0xff] (!%p732_p2)  ;;  %vm230_vm0 = vcmask (!%p732_p2), 130048  }
  0x5c   : > { %227 = sbr.rel (%p732_p2) target bundleno = 312 (0x138), region = 52  ;;  %v856_v4 = vpack.c.bf16 (!%p732_p2), %v229_v3, %v228_v2  ;;  %811 = vmatprep.mubr.msk.f32.mxu0 (!%p732_p2), %vm230_vm0, %v222_v0 }
  0x5e   : > { %857 = vmatprep.subr.bf16.mxu0 (!%p732_p2), %v856_v4 }
  0x5f   : > { %859 = vmatpush3.bf16.msra.mxu0 (!%p732_p2), %v856_v4 }
  0x62   : > { %812 = vmatmul.mubr.msk.f32.vlgmr.msra.gmra.mrb[0].mxu0 (!%p732_p2), %vm230_vm0, %v223_v1 }
 0x135   : > { %v813_v5 = vpop.f32.mrb[0].mxu0 }
 0x136   : > { %318 = vst [vmem:[#allocation2 + $0x10] sm:$0xff] %v813_v5  ;;  %v303_v6 = vpop.f32.mrb[1].mxu0 }
 0x137   : > { %317 = vst [vmem:[#allocation2] sm:$0xff] %v303_v6 }
 0x138 PF: > { %p735_p5 = scmp.ne.s32.totalorder %s1130_s15, 1 }
 0x139   : > { %vm328_vm1 = vcmask (!%p735_p5), 130048   ;;  %v459_v9 = vld [vmem:[#allocation8 + $0x100] sm:$0xff] (!%p735_p5)  ;;  %v460_v11 = vld [vmem:[#allocation8 + $0x108] sm:$0xff] (!%p735_p5)  ;;  %v461_v18 = vld [vmem:[#allocation8 + $0x110] sm:$0xff] (!%p735_p5) }
 0x13a   : > { %322 = sbr.rel (%p735_p5) target bundleno = 767 (0x2ff), region = 56  ;;  %818 = vmatprep.mubr.msk.f32.mxu0 (!%p735_p5), %vm328_vm1, %v222_v0  ;;  %v443_v12 = vld [vmem:[#allocation8 + $0x80] sm:$0xff] (!%p735_p5)  ;;  %v444_v13 = vld [vmem:[#allocation8 + $0x88] sm:$0xff] (!%p735_p5)  ;;  %v864_v14 = vpack.c.bf16 (!%p735_p5), %v460_v11, %v459_v9  ;;  %v462_v20 = vld [vmem:[#allocation8 + $0x118] sm:$0xff] (!%p735_p5) }
 0x13b   : > { %v866_v15 = vpack.c.bf16 (!%p735_p5), %v444_v13, %v443_v12  ;;  %v423_v16 = vld [vmem:[#allocation8] sm:$0xff] (!%p735_p5)  ;;  %v424_v17 = vld [vmem:[#allocation8 + $0x8] sm:$0xff] (!%p735_p5)  ;;  %v445_v21 = vld [vmem:[#allocation8 + $0x90] sm:$0xff] (!%p735_p5)  ;;  %v868_v23 = vpack.c.bf16 (!%p735_p5), %v462_v20, %v461_v18 }
 0x13c   : > { %v896_v19 = vpack.c.bf16 (!%p735_p5), %v424_v17, %v423_v16  ;;  %v446_v22 = vld [vmem:[#allocation8 + $0x98] sm:$0xff] (!%p735_p5)  ;;  %865 = vmatprep.subr.bf16.mxu1 (!%p735_p5), %v864_v14  ;;  %v425_v24 = vld [vmem:[#allocation8 + $0x10] sm:$0xff] (!%p735_p5)  ;;  %v463_v26 = vld [vmem:[#allocation8 + $0x120] sm:$0xff] (!%p735_p5) }
 0x13d   : > { %v1308_v8 = vld [vmem:[#allocation2 + $0x10] sm:$0xff] (!%p735_p5)  ;;  %v426_v25 = vld [vmem:[#allocation8 + $0x18] sm:$0xff] (!%p735_p5)  ;;  %867 = vmatpush3.bf16.msra.mxu1 (!%p735_p5), %v866_v15  ;;  %v870_v27 = vpack.c.bf16 (!%p735_p5), %v446_v22, %v445_v21  ;;  %v464_v29 = vld [vmem:[#allocation8 + $0x128] sm:$0xff] (!%p735_p5) }
 0x13e   : > { %v1306_v7 = vld [vmem:[#allocation2] sm:$0xff] (!%p735_p5)  ;;  %v900_v28 = vpack.c.bf16 (!%p735_p5), %v426_v25, %v425_v24  ;;  %869 = vmatprep.subr.bf16.mxu1 (!%p735_p5), %v868_v23  ;;  %v872_v31 = vpack.c.bf16 (!%p735_p5), %v464_v29, %v463_v26  ;;  %v448_v32 = vld [vmem:[#allocation8 + $0xa8] sm:$0xff] (!%p735_p5)  ;;  %v465_v35 = vld [vmem:[#allocation8 + $0x130] sm:$0xff] (!%p735_p5) }
 0x13f   : > { %v860_v10 = vpack.c.bf16 (!%p735_p5), %v1308_v8, %v1306_v7  ;;  %v447_v30 = vld [vmem:[#allocation8 + $0xa0] sm:$0xff] (!%p735_p5)  ;;  %v428_v34 = vld [vmem:[#allocation8 + $0x28] sm:$0xff] (!%p735_p5)  ;;  %v466_v36 = vld [vmem:[#allocation8 + $0x138] sm:$0xff] (!%p735_p5) }
 0x140   : > { %v427_v33 = vld [vmem:[#allocation8 + $0x20] sm:$0xff] (!%p735_p5)  ;;  %v874_v37 = vpack.c.bf16 (!%p735_p5), %v448_v32, %v447_v30  ;;  %v449_v39 = vld [vmem:[#allocation8 + $0xb0] sm:$0xff] (!%p735_p5)  ;;  %v876_v40 = vpack.c.bf16 (!%p735_p5), %v466_v36, %v465_v35  ;;  %v450_v41 = vld [vmem:[#allocation8 + $0xb8] sm:$0xff] (!%p735_p5) }
 0x141   : > { %861 = vmatprep.subr.bf16.mxu0 %v860_v10  ;;  %871 = vmatpush3.bf16.msra.mxu1 %v870_v27  ;;  %v904_v38 = vpack.c.bf16 %v428_v34, %v427_v33  ;;  %v429_v42 = vld [vmem:[#allocation8 + $0x30] sm:$0xff]  ;;  %v430_v43 = vld [vmem:[#allocation8 + $0x38] sm:$0xff]  ;;  %v467_v44 = vld [vmem:[#allocation8 + $0x140] sm:$0xff]  ;;  %v878_v46 = vpack.c.bf16 %v450_v41, %v449_v39 }
 0x142   : > { %863 = vmatpush3.bf16.msra.mxu0 %v860_v10  ;;  %873 = vmatprep.subr.bf16.mxu1 %v872_v31  ;;  %v468_v45 = vld [vmem:[#allocation8 + $0x148] sm:$0xff]  ;;  %v908_v47 = vpack.c.bf16 %v430_v43, %v429_v42  ;;  %v451_v49 = vld [vmem:[#allocation8 + $0xc0] sm:$0xff]  ;;  %v469_v55 = vld [vmem:[#allocation8 + $0x150] sm:$0xff] }
 0x143   : > { %897 = vmatprep.subr.bf16.mxu0 %v896_v19  ;;  %v880_v48 = vpack.c.bf16 %v468_v45, %v467_v44  ;;  %v452_v50 = vld [vmem:[#allocation8 + $0xc8] sm:$0xff]  ;;  %v431_v52 = vld [vmem:[#allocation8 + $0x40] sm:$0xff]  ;;  %v470_v56 = vld [vmem:[#allocation8 + $0x158] sm:$0xff] }
 0x144   : > { %v882_v51 = vpack.c.bf16 %v452_v50, %v451_v49  ;;  %v432_v53 = vld [vmem:[#allocation8 + $0x48] sm:$0xff]  ;;  %v884_v57 = vpack.c.bf16 %v470_v56, %v469_v55  ;;  %v453_v58 = vld [vmem:[#allocation8 + $0xd0] sm:$0xff]  ;;  %v454_v59 = vld [vmem:[#allocation8 + $0xd8] sm:$0xff] }
 0x145   : > { %819 = vmatmul.mubr.msk.f32.vlgmr.msra.gmra.mrb[0].mxu0 %vm328_vm1, %v223_v1  ;;  %875 = vmatpush3.bf16.msra.mxu1 %v874_v37  ;;  %v912_v54 = vpack.c.bf16 %v432_v53, %v431_v52  ;;  %v886_v60 = vpack.c.bf16 %v454_v59, %v453_v58  ;;  %v433_v61 = vld [vmem:[#allocation8 + $0x50] sm:$0xff]  ;;  %v434_v62 = vld [vmem:[#allocation8 + $0x58] sm:$0xff]  ;;  %v471_v0 = vld [vmem:[#allocation8 + $0x160] sm:$0xff] }
 0x146   : > { %899 = vmatpush3.bf16.msra.mxu0 %v896_v19  ;;  %877 = vmatprep.subr.bf16.mxu1 %v876_v40  ;;  %v916_v63 = vpack.c.bf16 %v434_v62, %v433_v61  ;;  %v472_v1 = vld [vmem:[#allocation8 + $0x168] sm:$0xff]  ;;  %v455_v3 = vld [vmem:[#allocation8 + $0xe0] sm:$0xff]  ;;  %v473_v11 = vld [vmem:[#allocation8 + $0x170] sm:$0xff] }
 0x147   : > { %901 = vmatprep.subr.bf16.mxu0 %v900_v28  ;;  %v888_v2 = vpack.c.bf16 %v472_v1, %v471_v0  ;;  %v456_v4 = vld [vmem:[#allocation8 + $0xe8] sm:$0xff]  ;;  %v435_v6 = vld [vmem:[#allocation8 + $0x60] sm:$0xff]  ;;  %v474_v12 = vld [vmem:[#allocation8 + $0x178] sm:$0xff] }
 0x148   : > { %v890_v5 = vpack.c.bf16 %v456_v4, %v455_v3  ;;  %v436_v9 = vld [vmem:[#allocation8 + $0x68] sm:$0xff]  ;;  %v892_v13 = vpack.c.bf16 %v474_v12, %v473_v11  ;;  %v457_v14 = vld [vmem:[#allocation8 + $0xf0] sm:$0xff]  ;;  %v458_v15 = vld [vmem:[#allocation8 + $0xf8] sm:$0xff] }
 0x149   : > { %879 = vmatpush3.bf16.msra.mxu1 %v878_v46  ;;  %v920_v10 = vpack.c.bf16 %v436_v9, %v435_v6  ;;  %v894_v16 = vpack.c.bf16 %v458_v15, %v457_v14  ;;  %v437_v17 = vld [vmem:[#allocation8 + $0x70] sm:$0xff]  ;;  %v438_v18 = vld [vmem:[#allocation8 + $0x78] sm:$0xff]  ;;  %v326_v19 = vld [vmem:[#allocation3] sm:$0xff] }
 0x14a   : > { %903 = vmatpush3.bf16.msra.mxu0 %v900_v28  ;;  %881 = vmatprep.subr.bf16.mxu1 %v880_v48  ;;  %v924_v20 = vpack.c.bf16 %v438_v18, %v437_v17  ;;  %v327_v21 = vld [vmem:[#allocation3 + $0x8] sm:$0xff]  ;;  %v738_v33 = vld [vmem:[%s1359_s3] ss:$0 sm:$0xff] }
 0x14b   : > { %905 = vmatprep.subr.bf16.mxu0 %v904_v38  ;;  %853 = vmatprep.mubr.f32.mxu0 %v326_v19 }
 0x14d   : > { %883 = vmatpush3.bf16.msra.mxu1 %v882_v51 }
 0x14e   : > { %907 = vmatpush3.bf16.msra.mxu0 %v904_v38  ;;  %885 = vmatprep.subr.bf16.mxu1 %v884_v57 }
 0x14f   : > { %909 = vmatprep.subr.bf16.mxu0 %v908_v47 }
 0x151   : > { %887 = vmatpush3.bf16.msra.mxu1 %v886_v60 }
 0x152   : > { %911 = vmatpush3.bf16.msra.mxu0 %v908_v47  ;;  %889 = vmatprep.subr.bf16.mxu1 %v888_v2 }
 0x153   : > { %913 = vmatprep.subr.bf16.mxu0 %v912_v54 }
 0x155   : > { %891 = vmatpush3.bf16.msra.mxu1 %v890_v5 }
 0x156   : > { %915 = vmatpush3.bf16.msra.mxu0 %v912_v54  ;;  %893 = vmatprep.subr.bf16.mxu1 %v892_v13 }
 0x157   : > { %917 = vmatprep.subr.bf16.mxu0 %v916_v63 }
 0x159   : > { %895 = vmatpush3.bf16.msra.mxu1 %v894_v16 }
 0x15a   : > { %919 = vmatpush3.bf16.msra.mxu0 %v916_v63 }
 0x15b   : > { %921 = vmatprep.subr.bf16.mxu0 %v920_v10 }
 0x15e   : > { %923 = vmatpush3.bf16.msra.mxu0 %v920_v10 }
 0x15f   : > { %925 = vmatprep.subr.bf16.mxu0 %v924_v20 }
 0x162   : > { %927 = vmatpush3.bf16.msra.mxu0 %v924_v20 }
 0x165   : > { %854 = vmatmul.mubr.f32.vlgmr.msra.gmra.mrb[2].mxu0 %v327_v21 }
 0x218   : > { %v820_v22 = vpop.f32.mrb[0].mxu0 }
 0x219   : > { %v411_v23 = vmul.f32 2.0, %v820_v22  ;;  %v401_v24 = vpop.f32.mrb[1].mxu0 }
 0x21a   : > { %v410_v25 = vmul.f32 2.0, %v401_v24 }
 0x21b   : > { %v413_v26 = vsub.f32 %v411_v23, %v327_v21 }
 0x21c   : > { %v412_v27 = vsub.f32 %v410_v25, %v326_v19 }
 0x21e   : > { %539 = vmatprep.mubr.f32.mxu1 %v412_v27 }
 0x21f   : > { %540 = vmatmul.mubr.f32.vlgmr.msra.gmra.mrb[0].mxu1 %v1306_v7 }
 0x220   : > { %544 = vmatprep.mubr.f32.mxu1 %v413_v26 }
 0x223   : > { %545 = vmatmul.mubr.f32.gmra.mrb[2].mxu1 %v1308_v8 }
 0x238   : > { %v855_v28 = vpop.f32.mrb[2].mxu0 }
 0x239   : > { %v616_v29 = vpop.f32.mrb[3].mxu0 }
 0x2f2   : > { %v783_v30 = vpop.f32.mrb[0].mxu1 }
 0x2f3   : > { %v784_v31 = vpop.f32.mrb[1].mxu1 }
 0x2f4   : > { %v785_v32 = vadd.f32 %v784_v31, %v783_v30 }
 0x2f6   : > { %v617_v34 = vadd.f32 %v785_v32, %v616_v29  ;;  %v786_v35 = vpop.f32.mrb[2].mxu1 }
 0x2f7   : > { %v787_v36 = vpop.f32.mrb[3].mxu1 }
 0x2f8   : > { %v632_v37 = vadd.f32 %v738_v33, %v617_v34  ;;  %v788_v38 = vadd.f32 %v787_v36, %v786_v35 }
 0x2fa   : > { %635 = vst [vmem:[#allocation9] sm:$0xff] %v632_v37  ;;  %v622_v39 = vadd.f32 %v855_v28, %v788_v38 }
 0x2fc   : > { %v633_v7 = vadd.f32 %v738_v33, %v622_v39 }
 0x2fe   : > { %636 = vst [vmem:[#allocation9 + $0x8] sm:$0xff] %v633_v7 }
 0x2ff PF: > { %p1321_p10 = scmp.eq.s32.totalorder %s723_s18, 1  ;;  %s1145_s23 = smov [#allocation9]  }
 0x300   : > { %s643_s7 = sshll.u32 %s1145_s23, 4  ;;  %s644_s7 = int_to_ptr.vmem [resolvable:$true] %s643_s7 }
 0x301   : > { %s1078_s11 = scalar_lea.vmem %s644_s7, 256  ;;  %p1085_p6 = scmp.lt.s32.totalorder %s644_s7, %s644_s7 }
 0x302   : > { %p1079_p11 = scmp.ne.s32.totalorder %s644_s7, %s1078_s11  ;;  %p1086_p0 = scmp.lt.s32.totalorder %s1078_s11, %s1078_s11 }
 0x304   : > { %p1080_p12 = pnand %p1079_p11, %p1321_p10  ;;  %p1087_p1 = por %p1086_p0, %p1085_p6 }
 0x306   : > { %p1081_p13 = pneg %p1080_p12 }
 0x308   : > { %p1088_p4 = pnand %p1087_p1, %p1081_p13 }
 0x30a   : > { %1091 = shalt.err (!%p1088_p4)
}
 0x30b   : > { %s1092_s18 = scalar_lea.hbm %s1360_s4, 256 }
 0x30c   : > { %p1093_p7 = scmp.ne.s32.totalorder %s1360_s4, %s1092_s18  ;;  %p1098_p8 = scmp.lt.u32.totalorder %s1092_s18, %s1360_s4 }
 0x30e   : > { %p1094_p9 = pnand %p1093_p7, %p1321_p10 }
 0x310   : > { %p1095_p3 = pneg %p1094_p9 }
 0x312   : > { %p1100_p2 = pnand %p1098_p8, %p1095_p3 }
 0x314   : > { %1103 = shalt.err (!%p1100_p2)
}
 0x315   : > { %s1146_s13 = smov 128   ;;  %s1147_s14 = smov 8  }
 0x316   : > { %941 = dma.vmem_to_hbm [thread:$0]  (%p1321_p10), %s644_s7, 256, %s1360_s4, [#allocation5], %s1146_s13, %s1146_s13, %s1147_s14  }
 0x317   : > { %1125 = dma.done.wait (%p1321_p10), [#allocation5], 256  }
 0x318   : > { %1127 = vsyncadd (%p1321_p10), [#allocation5], 4294967040 }
 0x319 PF: > { %s17_s17 = sadd.s32 1, %s1138_s17   ;;  %s1372_s15 = smov %s1134_s16 }
 0x31a   : > { %p14_p5 = scmp.ge.s32.totalorder %s17_s17, 4   ;;  %s1373_s16 = smov %s1375_s24 }
 0x31c   :  { %16 = sbr.rel (!%p14_p5) target bundleno = 4 (0x4), region = 86 }
 0x323   :  { %659 = vsyncpa [#allocation4], 1 }
 0x324   :  { %661 = vsyncpa [#allocation4 + $0x1], 1 }
 0x325   :  { %662 = vsyncpa [#allocation7], 1 }
 0x326   :  { %663 = vsyncpa [#allocation5], 1 }
 0x327   :  { %665 = vsyncpa [#allocation5 + $0x1], 1 }

</bundles_post_ra>
